<compile_context>
chip_gen: v6e
topology: v6e:2x2x1
jax: 0.10.0
libtpu: 0.0.40
codegen_flags: <defaults>
</compile_context>

<pallas_src>
from functools import partial

import numpy as np
import jax
import jax.numpy as jnp
from jax.experimental import pallas as pl
from jax.experimental.pallas import tpu as pltpu


def _round_up(x, m):
    return ((x + m - 1) // m) * m


def _conv3x3_relu_kernel(x_ref, w_ref, b_ref, o_ref, *, Wp, n_pix):
    """One (image, C_out-tile) grid step.

    x_ref: (CI, L_in)     flattened zero-padded image, f32, VMEM
    w_ref: (9, CO_t, CI)  conv taps, tap index t = 3*di + dj, f32, VMEM
    b_ref: (CO_t, 1)      bias, f32, VMEM
    o_ref: (CO_t, n_pix)  output slab over the flat pixel axis q = h*Wp + w
    """
    co_t = o_ref.shape[0]
    acc = jnp.zeros((co_t, n_pix), dtype=jnp.float32)
    for di in range(3):
        for dj in range(3):
            off = di * Wp + dj                      # static -> contiguous lane slice
            x_tap = x_ref[:, off:off + n_pix]       # (CI, n_pix) view -> load
            w_tap = w_ref[3 * di + dj]              # (CO_t, CI)
            acc = acc + jnp.dot(w_tap, x_tap, preferred_element_type=jnp.float32)
    # Bias (lane-broadcast from (CO_t, 1)) + fused ReLU on the lane-dense slab.
    o_ref[...] = jnp.maximum(acc + b_ref[...], 0.0).astype(o_ref.dtype)


def _pick_cout_tile(CO, CI, L_in, n_pix, budget_bytes=10 * 1024 * 1024):
    """Largest multiple-of-8 divisor of CO whose per-step VMEM footprint
    (double-buffered blocks + in-kernel accumulator / tap-load temporaries)
    fits the budget.  Falls back to 8."""
    def est(co_t):
        blocks = 2 * (CI * L_in + 9 * co_t * CI + co_t + co_t * n_pix)  # dbl-buffered
        temps = co_t * n_pix + CI * n_pix                               # acc + one tap
        return 4 * (blocks + temps)

    best = 8
    for co_t in range(8, CO + 1, 8):
        if CO % co_t == 0 and est(co_t) <= budget_bytes:
            best = co_t
    return best, est(best)


def single_conv_forward(x, weight, bias):
    """Pallas equivalent of single_conv.forward: ReLU(Conv2d(x, weight, bias, pad=1)).

    x:      (N, C_in, H, W)   float32
    weight: (C_out, C_in, 3, 3) float32
    bias:   (C_out,)          float32
    returns (N, C_out, H, W)  float32
    """
    N, C_in, H, W = x.shape
    C_out, C_in_w, kh, kw = weight.shape
    assert C_in_w == C_in, "weight in_channels must match input"
    assert kh == 3 and kw == 3, "single_conv uses a 3x3 kernel"

    Hp, Wp = H + 2, W + 2
    n_pix = H * Wp              # flat output pixels (incl. 2 junk columns per row)
    L_in = Hp * Wp + 2          # headroom so the max tap slice (off = 2*Wp+2) fits

    CI = _round_up(C_in, 8)
    CO = _round_up(C_out, 8)

    # ---- wrapper-side layout plumbing (pad + flatten; no 9x im2col blowup) ----
    xp = jnp.pad(x.astype(jnp.float32),
                 ((0, 0), (0, CI - C_in), (1, 1), (1, 1)))            # (N, CI, Hp, Wp)
    x_flat = xp.reshape(N, CI, Hp * Wp)
    x_flat = jnp.pad(x_flat, ((0, 0), (0, 0), (0, L_in - Hp * Wp)))    # (N, CI, L_in)

    wpad = jnp.pad(weight.astype(jnp.float32),
                   ((0, CO - C_out), (0, CI - C_in), (0, 0), (0, 0)))  # (CO, CI, 3, 3)
    w_taps = jnp.transpose(wpad, (2, 3, 0, 1)).reshape(9, CO, CI)      # t = 3*di + dj

    b_vec = jnp.pad(bias.astype(jnp.float32), (0, CO - C_out)).reshape(CO, 1)

    co_t, est_bytes = _pick_cout_tile(CO, CI, L_in, n_pix)
    grid = (N, CO // co_t)

    cp_kwargs = dict(dimension_semantics=("parallel", "parallel"))
    if est_bytes > 12 * 1024 * 1024:
        # Large single-image blocks: raise the scoped-VMEM limit, but stay well
        # inside v7x's 64 MiB physical VMEM (v5e/v6e have 128 MiB physical).
        cp_kwargs["vmem_limit_bytes"] = int(min(est_bytes + (8 << 20), 48 << 20))

    kernel = partial(_conv3x3_relu_kernel, Wp=Wp, n_pix=n_pix)

    out_flat = pl.pallas_call(
        kernel,
        out_shape=jax.ShapeDtypeStruct((N, CO, n_pix), jnp.float32),
        grid=grid,
        in_specs=[
            # One flattened padded image per step (re-used across cout tiles).
            pl.BlockSpec((None, CI, L_in), lambda n, c: (n, 0, 0)),
            # Only this cout-tile's taps in VMEM -> bounded SMEM-free weight footprint.
            pl.BlockSpec((9, co_t, CI), lambda n, c: (0, c, 0)),
            pl.BlockSpec((co_t, 1), lambda n, c: (c, 0)),
        ],
        out_specs=pl.BlockSpec((None, co_t, n_pix), lambda n, c: (n, c, 0)),
        compiler_params=pltpu.CompilerParams(**cp_kwargs),
    )(x_flat, w_taps, b_vec)

    # (N, CO, H*Wp) -> (N, C_out, H, W): drop padded channels and junk columns.
    return out_flat.reshape(N, CO, H, Wp)[:, :C_out, :, :W]


if __name__ == "__main__":
    # Deterministic small example consistent with the module's forward:
    # NCHW input, Conv2d(in_ch=4, out_ch=4, 3, padding=1) + ReLU.
    key = jax.random.PRNGKey(0)
    kx, kw_, kb = jax.random.split(key, 3)
    N, C_in, C_out, H, W = 2, 4, 4, 16, 16

    x = jax.random.normal(kx, (N, C_in, H, W), dtype=jnp.float32)
    weight = jax.random.normal(kw_, (C_out, C_in, 3, 3), dtype=jnp.float32) * 0.2
    bias = jax.random.normal(kb, (C_out,), dtype=jnp.float32) * 0.1

    out = jax.block_until_ready(single_conv_forward(x, weight, bias))

    # Host-side float64 reference (cross-correlation + bias + ReLU), matching
    # PyTorch Conv2d(padding=1) semantics.
    xn = np.asarray(x, dtype=np.float64)
    wn = np.asarray(weight, dtype=np.float64)
    bn = np.asarray(bias, dtype=np.float64)
    xpad = np.pad(xn, ((0, 0), (0, 0), (1, 1), (1, 1)))
    ref = np.zeros((N, C_out, H, W), dtype=np.float64)
    for di in range(3):
        for dj in range(3):
            ref += np.einsum("oc,nchw->nohw", wn[:, :, di, dj],
                             xpad[:, :, di:di + H, dj:dj + W])
    ref = np.maximum(ref + bn[None, :, None, None], 0.0)

    np.testing.assert_allclose(np.asarray(out), ref, rtol=1e-4, atol=1e-4)
    print("KERNEL_OK")
</pallas_src>

<mosaic_0001>
module attributes {stable_mosaic.version = 11 : i64} {
  func.func @_conv3x3_relu_kernel(%arg0: i32, %arg1: i32, %arg2: memref<1x8x326xf32, #tpu.memory_space<vmem>>, %arg3: memref<9x8x8xf32, #tpu.memory_space<vmem>>, %arg4: memref<8x1xf32, #tpu.memory_space<vmem>>, %arg5: memref<1x8x288xf32, #tpu.memory_space<vmem>>) attributes {dimension_semantics = [#tpu.dimension_semantics<parallel>, #tpu.dimension_semantics<parallel>], iteration_bounds = array<i64: 2, 1>, scalar_prefetch = 0 : i64, scratch_operands = 0 : i64, tpu.core_type = #tpu.core_type<tc>, window_params = [{transform_indices = @transform_0, window_bounds = array<i64: 1, 8, 326>}, {transform_indices = @transform_1, window_bounds = array<i64: 9, 8, 8>}, {transform_indices = @transform_2, window_bounds = array<i64: 8, 1>}, {transform_indices = @transform_3, window_bounds = array<i64: 1, 8, 288>}]} {
    %cst = arith.constant 0.000000e+00 : f32
    %0 = vector.broadcast %cst : f32 to vector<8x288xf32>
    %c0 = arith.constant 0 : index
    %c0_0 = arith.constant 0 : index
    %c0_1 = arith.constant 0 : index
    %1 = vector.load %arg2[%c0, %c0_0, %c0_1] : memref<1x8x326xf32, #tpu.memory_space<vmem>>, vector<1x8x288xf32>
    %2 = vector.shape_cast %1 : vector<1x8x288xf32> to vector<8x288xf32>
    %c0_2 = arith.constant 0 : index
    %c0_3 = arith.constant 0 : index
    %c0_4 = arith.constant 0 : index
    %3 = vector.load %arg3[%c0_2, %c0_3, %c0_4] : memref<9x8x8xf32, #tpu.memory_space<vmem>>, vector<1x8x8xf32>
    %4 = vector.shape_cast %3 : vector<1x8x8xf32> to vector<8x8xf32>
    %cst_5 = arith.constant dense<0.000000e+00> : vector<8x288xf32>
    %5 = tpu.matmul %4, %2, %cst_5 {dimension_numbers = #tpu.dot_dimension_numbers<[1], [0], [0], [1], [0, 0, 1, 1], [], []>} : vector<8x8xf32>, vector<8x288xf32>, vector<8x288xf32> -> vector<8x288xf32>
    %6 = arith.addf %0, %5 : vector<8x288xf32>
    %c0_6 = arith.constant 0 : index
    %c0_7 = arith.constant 0 : index
    %c1 = arith.constant 1 : index
    %7 = vector.load %arg2[%c0_6, %c0_7, %c1] : memref<1x8x326xf32, #tpu.memory_space<vmem>>, vector<1x8x288xf32>
    %8 = vector.shape_cast %7 : vector<1x8x288xf32> to vector<8x288xf32>
    %c1_8 = arith.constant 1 : index
    %c0_9 = arith.constant 0 : index
    %c0_10 = arith.constant 0 : index
    %9 = vector.load %arg3[%c1_8, %c0_9, %c0_10] : memref<9x8x8xf32, #tpu.memory_space<vmem>>, vector<1x8x8xf32>
    %10 = vector.shape_cast %9 : vector<1x8x8xf32> to vector<8x8xf32>
    %cst_11 = arith.constant dense<0.000000e+00> : vector<8x288xf32>
    %11 = tpu.matmul %10, %8, %cst_11 {dimension_numbers = #tpu.dot_dimension_numbers<[1], [0], [0], [1], [0, 0, 1, 1], [], []>} : vector<8x8xf32>, vector<8x288xf32>, vector<8x288xf32> -> vector<8x288xf32>
    %12 = arith.addf %6, %11 : vector<8x288xf32>
    %c0_12 = arith.constant 0 : index
    %c0_13 = arith.constant 0 : index
    %c2 = arith.constant 2 : index
    %13 = vector.load %arg2[%c0_12, %c0_13, %c2] : memref<1x8x326xf32, #tpu.memory_space<vmem>>, vector<1x8x288xf32>
    %14 = vector.shape_cast %13 : vector<1x8x288xf32> to vector<8x288xf32>
    %c2_14 = arith.constant 2 : index
    %c0_15 = arith.constant 0 : index
    %c0_16 = arith.constant 0 : index
    %15 = vector.load %arg3[%c2_14, %c0_15, %c0_16] : memref<9x8x8xf32, #tpu.memory_space<vmem>>, vector<1x8x8xf32>
    %16 = vector.shape_cast %15 : vector<1x8x8xf32> to vector<8x8xf32>
    %cst_17 = arith.constant dense<0.000000e+00> : vector<8x288xf32>
    %17 = tpu.matmul %16, %14, %cst_17 {dimension_numbers = #tpu.dot_dimension_numbers<[1], [0], [0], [1], [0, 0, 1, 1], [], []>} : vector<8x8xf32>, vector<8x288xf32>, vector<8x288xf32> -> vector<8x288xf32>
    %18 = arith.addf %12, %17 : vector<8x288xf32>
    %c0_18 = arith.constant 0 : index
    %c0_19 = arith.constant 0 : index
    %c18 = arith.constant 18 : index
    %19 = vector.load %arg2[%c0_18, %c0_19, %c18] : memref<1x8x326xf32, #tpu.memory_space<vmem>>, vector<1x8x288xf32>
    %20 = vector.shape_cast %19 : vector<1x8x288xf32> to vector<8x288xf32>
    %c3 = arith.constant 3 : index
    %c0_20 = arith.constant 0 : index
    %c0_21 = arith.constant 0 : index
    %21 = vector.load %arg3[%c3, %c0_20, %c0_21] : memref<9x8x8xf32, #tpu.memory_space<vmem>>, vector<1x8x8xf32>
    %22 = vector.shape_cast %21 : vector<1x8x8xf32> to vector<8x8xf32>
    %cst_22 = arith.constant dense<0.000000e+00> : vector<8x288xf32>
    %23 = tpu.matmul %22, %20, %cst_22 {dimension_numbers = #tpu.dot_dimension_numbers<[1], [0], [0], [1], [0, 0, 1, 1], [], []>} : vector<8x8xf32>, vector<8x288xf32>, vector<8x288xf32> -> vector<8x288xf32>
    %24 = arith.addf %18, %23 : vector<8x288xf32>
    %c0_23 = arith.constant 0 : index
    %c0_24 = arith.constant 0 : index
    %c19 = arith.constant 19 : index
    %25 = vector.load %arg2[%c0_23, %c0_24, %c19] : memref<1x8x326xf32, #tpu.memory_space<vmem>>, vector<1x8x288xf32>
    %26 = vector.shape_cast %25 : vector<1x8x288xf32> to vector<8x288xf32>
    %c4 = arith.constant 4 : index
    %c0_25 = arith.constant 0 : index
    %c0_26 = arith.constant 0 : index
    %27 = vector.load %arg3[%c4, %c0_25, %c0_26] : memref<9x8x8xf32, #tpu.memory_space<vmem>>, vector<1x8x8xf32>
    %28 = vector.shape_cast %27 : vector<1x8x8xf32> to vector<8x8xf32>
    %cst_27 = arith.constant dense<0.000000e+00> : vector<8x288xf32>
    %29 = tpu.matmul %28, %26, %cst_27 {dimension_numbers = #tpu.dot_dimension_numbers<[1], [0], [0], [1], [0, 0, 1, 1], [], []>} : vector<8x8xf32>, vector<8x288xf32>, vector<8x288xf32> -> vector<8x288xf32>
    %30 = arith.addf %24, %29 : vector<8x288xf32>
    %c0_28 = arith.constant 0 : index
    %c0_29 = arith.constant 0 : index
    %c20 = arith.constant 20 : index
    %31 = vector.load %arg2[%c0_28, %c0_29, %c20] : memref<1x8x326xf32, #tpu.memory_space<vmem>>, vector<1x8x288xf32>
    %32 = vector.shape_cast %31 : vector<1x8x288xf32> to vector<8x288xf32>
    %c5 = arith.constant 5 : index
    %c0_30 = arith.constant 0 : index
    %c0_31 = arith.constant 0 : index
    %33 = vector.load %arg3[%c5, %c0_30, %c0_31] : memref<9x8x8xf32, #tpu.memory_space<vmem>>, vector<1x8x8xf32>
    %34 = vector.shape_cast %33 : vector<1x8x8xf32> to vector<8x8xf32>
    %cst_32 = arith.constant dense<0.000000e+00> : vector<8x288xf32>
    %35 = tpu.matmul %34, %32, %cst_32 {dimension_numbers = #tpu.dot_dimension_numbers<[1], [0], [0], [1], [0, 0, 1, 1], [], []>} : vector<8x8xf32>, vector<8x288xf32>, vector<8x288xf32> -> vector<8x288xf32>
    %36 = arith.addf %30, %35 : vector<8x288xf32>
    %c0_33 = arith.constant 0 : index
    %c0_34 = arith.constant 0 : index
    %c36 = arith.constant 36 : index
    %37 = vector.load %arg2[%c0_33, %c0_34, %c36] : memref<1x8x326xf32, #tpu.memory_space<vmem>>, vector<1x8x288xf32>
    %38 = vector.shape_cast %37 : vector<1x8x288xf32> to vector<8x288xf32>
    %c6 = arith.constant 6 : index
    %c0_35 = arith.constant 0 : index
    %c0_36 = arith.constant 0 : index
    %39 = vector.load %arg3[%c6, %c0_35, %c0_36] : memref<9x8x8xf32, #tpu.memory_space<vmem>>, vector<1x8x8xf32>
    %40 = vector.shape_cast %39 : vector<1x8x8xf32> to vector<8x8xf32>
    %cst_37 = arith.constant dense<0.000000e+00> : vector<8x288xf32>
    %41 = tpu.matmul %40, %38, %cst_37 {dimension_numbers = #tpu.dot_dimension_numbers<[1], [0], [0], [1], [0, 0, 1, 1], [], []>} : vector<8x8xf32>, vector<8x288xf32>, vector<8x288xf32> -> vector<8x288xf32>
    %42 = arith.addf %36, %41 : vector<8x288xf32>
    %c0_38 = arith.constant 0 : index
    %c0_39 = arith.constant 0 : index
    %c37 = arith.constant 37 : index
    %43 = vector.load %arg2[%c0_38, %c0_39, %c37] : memref<1x8x326xf32, #tpu.memory_space<vmem>>, vector<1x8x288xf32>
    %44 = vector.shape_cast %43 : vector<1x8x288xf32> to vector<8x288xf32>
    %c7 = arith.constant 7 : index
    %c0_40 = arith.constant 0 : index
    %c0_41 = arith.constant 0 : index
    %45 = vector.load %arg3[%c7, %c0_40, %c0_41] : memref<9x8x8xf32, #tpu.memory_space<vmem>>, vector<1x8x8xf32>
    %46 = vector.shape_cast %45 : vector<1x8x8xf32> to vector<8x8xf32>
    %cst_42 = arith.constant dense<0.000000e+00> : vector<8x288xf32>
    %47 = tpu.matmul %46, %44, %cst_42 {dimension_numbers = #tpu.dot_dimension_numbers<[1], [0], [0], [1], [0, 0, 1, 1], [], []>} : vector<8x8xf32>, vector<8x288xf32>, vector<8x288xf32> -> vector<8x288xf32>
    %48 = arith.addf %42, %47 : vector<8x288xf32>
    %c0_43 = arith.constant 0 : index
    %c0_44 = arith.constant 0 : index
    %c38 = arith.constant 38 : index
    %49 = vector.load %arg2[%c0_43, %c0_44, %c38] : memref<1x8x326xf32, #tpu.memory_space<vmem>>, vector<1x8x288xf32>
    %50 = vector.shape_cast %49 : vector<1x8x288xf32> to vector<8x288xf32>
    %c8 = arith.constant 8 : index
    %c0_45 = arith.constant 0 : index
    %c0_46 = arith.constant 0 : index
    %51 = vector.load %arg3[%c8, %c0_45, %c0_46] : memref<9x8x8xf32, #tpu.memory_space<vmem>>, vector<1x8x8xf32>
    %52 = vector.shape_cast %51 : vector<1x8x8xf32> to vector<8x8xf32>
    %cst_47 = arith.constant dense<0.000000e+00> : vector<8x288xf32>
    %53 = tpu.matmul %52, %50, %cst_47 {dimension_numbers = #tpu.dot_dimension_numbers<[1], [0], [0], [1], [0, 0, 1, 1], [], []>} : vector<8x8xf32>, vector<8x288xf32>, vector<8x288xf32> -> vector<8x288xf32>
    %54 = arith.addf %48, %53 : vector<8x288xf32>
    %c0_48 = arith.constant 0 : index
    %c0_49 = arith.constant 0 : index
    %55 = vector.load %arg4[%c0_48, %c0_49] : memref<8x1xf32, #tpu.memory_space<vmem>>, vector<8x1xf32>
    %56 = vector.broadcast %55 : vector<8x1xf32> to vector<8x288xf32>
    %57 = arith.addf %54, %56 : vector<8x288xf32>
    %cst_50 = arith.constant 0.000000e+00 : f32
    %58 = vector.broadcast %cst_50 : f32 to vector<8x288xf32>
    %59 = arith.maximumf %57, %58 : vector<8x288xf32>
    %c0_51 = arith.constant 0 : index
    %c0_52 = arith.constant 0 : index
    %c0_53 = arith.constant 0 : index
    %60 = vector.load %arg5[%c0_51, %c0_52, %c0_53] : memref<1x8x288xf32, #tpu.memory_space<vmem>>, vector<1x8x288xf32>
    %61 = vector.shape_cast %60 : vector<1x8x288xf32> to vector<8x288xf32>
    %62 = vector.shape_cast %59 : vector<8x288xf32> to vector<1x8x288xf32>
    tpu.vector_store %arg5[%c0_51, %c0_52, %c0_53], %62 {strides = array<i32>} : memref<1x8x288xf32, #tpu.memory_space<vmem>>, vector<1x8x288xf32>,
    return
  }
  func.func @transform_0(%arg0: i32, %arg1: i32) -> (i32, i32, i32) {
    %c0_i32 = arith.constant 0 : i32
    %c0_i32_0 = arith.constant 0 : i32
    %c0_i32_1 = arith.constant 0 : i32
    return %arg0, %c0_i32, %c0_i32_0 : i32, i32, i32
  }
  func.func @transform_1(%arg0: i32, %arg1: i32) -> (i32, i32, i32) {
    %c0_i32 = arith.constant 0 : i32
    %c0_i32_0 = arith.constant 0 : i32
    %c0_i32_1 = arith.constant 0 : i32
    return %c0_i32, %arg1, %c0_i32_0 : i32, i32, i32
  }
  func.func @transform_2(%arg0: i32, %arg1: i32) -> (i32, i32) {
    %c0_i32 = arith.constant 0 : i32
    %c0_i32_0 = arith.constant 0 : i32
    return %arg1, %c0_i32 : i32, i32
  }
  func.func @transform_3(%arg0: i32, %arg1: i32) -> (i32, i32, i32) {
    %c0_i32 = arith.constant 0 : i32
    %c0_i32_0 = arith.constant 0 : i32
    return %arg0, %arg1, %c0_i32 : i32, i32, i32
  }
}

</mosaic_0001>

<bundles_post_ra>
// kernel: tpu_custom_call.1
= control target key start
LH: loop header
LB: loop body
LE: loop exit
PB: predicated region body
PF: predicated region fallthrough
CT: control target
= control target key end

     0   :  { %8 = vsyncpa [#allocation3], 0  ;;  %s2262_s0 = inlined_call_operand.vmem [shape: f32[2,8,326], index: 0, kind: input, shape index: {}]   ;;  %s2263_s1 = inlined_call_operand.vmem [shape: f32[9,8,8], index: 1, kind: input, shape index: {}]   ;;  %s2264_s2 = inlined_call_operand.vmem [shape: f32[8,1], index: 2, kind: input, shape index: {}]   ;;  %s2265_s3 = inlined_call_operand.hbm [shape: f32[2,8,288], index: 3, kind: output, shape index: {}]  }
   0x1   :  { %10 = vsyncpa [#allocation3 + $0x1], 0  ;;  %s2067_s12 = smov 0   ;;  %s2069_s13 = smov 0  }
   0x2   :  { %s2071_s14 = smov 0   ;;  %s2073_s15 = smov 0  }
   0x3   :  { %s2075_s16 = smov 0   ;;  %s2077_s17 = smov 0  }
   0x4 LB: > { %s1787_s18 = sadd.s32 4294967295, %s2033_s17   ;;  %s1788_s19 = sadd.s32 4294967294, %s2033_s17   ;;  %s2033_s17 = sphi %s2077_s17, %s16_s17   ;;  %s2029_s16 = sphi %s2075_s16, %s2272_s16   ;;  %s2025_s15 = sphi %s2073_s15, %s2271_s15   ;;  %s2021_s14 = sphi %s2071_s14, %s2270_s14   ;;  %s2017_s13 = sphi %s2069_s13, %s2269_s13   ;;  %s2013_s12 = sphi %s2067_s12, %s2268_s12  }
   0x5   : > { %s28_s20 = sadd.s32 1, %s2029_s16  ;;  %s115_s21 = sadd.s32 1, %s2021_s14 }
   0x6   : > { %p30_p0 = scmp.ge.s32.totalorder %s28_s20, 2  ;;  %p125_p1 = scmp.ne.s32.totalorder %s2021_s14, %s2017_s13 }
   0x7   : > { %p126_p2 = scmp.eq.s32.totalorder %s1787_s18, 1  ;;  %p131_p3 = scmp.ne.s32.totalorder %s2017_s13, %s2013_s12 }
   0x8   : > { %s2274_s20 = smov (%p30_p0, %s28_s20), 0  ;;  %p132_p5 = scmp.eq.s32.totalorder %s1788_s19, 1 }
   0x9   : > { %p2107_p4 = por %p126_p2, %p125_p1  ;;  %s110_s23 = ssub.s32 %s2029_s16, %s2274_s20 }
   0xa   : > { %p1793_p6 = scmp.ge.s32.totalorder %s2033_s17, 1  ;;  %p113_p7 = scmp.eq.s32.totalorder %s110_s23, 0 }
   0xb   : > { %p2114_p8 = por %p132_p5, %p131_p3  ;;  %p172_p9 = scmp.lt.s32.totalorder %s2033_s17, 3 }
   0xc   : > { %s2120_s25 = scalar_select %p113_p7, %s2021_s14, %s115_s21  }
   0xd   : > { %p173_p10 = pnand %p1793_p6, %p172_p9 }
   0xe   : > { %p204_p11 = scmp.lt.s32.totalorder (!%p173_p10), %s2025_s15, 1  ;;  %s2037_s4 = smov (!%p173_p10), 127  }
   0xf   : > { %176 = sbr.rel (%p173_p10) target bundleno = 402 (0x192), region = 32  ;;  %s2038_s5 = smov (!%p173_p10), 126  }
  0x10   : > { %s2039_s6 = smov (!%p173_p10), 110   ;;  %s2040_s7 = smov (!%p173_p10), 109  }
  0x11   : > { %s2041_s8 = smov (!%p173_p10), 108   ;;  %s2042_s9 = smov (!%p173_p10), 92  }
  0x12   : > { %s2044_s10 = smov (!%p173_p10), 91   ;;  %s2045_s11 = smov (!%p173_p10), 90  }
  0x13   : > { %s201_s23 = sand.u32 (!%p173_p10), 1, %s2017_s13  }
  0x14   : > { %v2035_v0 = vmov 0.0   ;;  %vm2036_vm0 = vmmov 0   ;;  %s205_s26 = scalar_select %p204_p11, %s2025_s15, 1  ;;  %v2043_v4 = vmov 0   ;;  %v1654_v5 = vld [vmem:[%s2264_s2] sm:$0xff]  ;;  %vm232_vm1 = vcmask 1039360  }
  0x15   : > { %1842 = vmatprep.subr.mxu1 %v2035_v0  ;;  %1844 = vmatprep.mubr.msk.f32.mxu1 %vm2036_vm0, %v2035_v0  ;;  %v1795_v8 = vld [vmem:[%s2263_s1 + $0x8] sm:$0xff]  ;;  %vm238_vm2 = vcmask 64512   ;;  %vm535_vm3 = vcmask 1031168   ;;  %v220_v15 = vld [vmem:[%s2263_s1] sm:$0xff]  ;;  %vm696_vm4 = vcmask 900096   ;;  %v1800_v19 = vld [vmem:[%s2263_s1 + $0x10] sm:$0xff] }
  0x16   : > { %306 = vmatprep.mubr.f32.mxu0 %v2035_v0  ;;  %s1888_s27 = smul.u32 24, %s205_s26  ;;  %1956 = vset.pattern.permute.xlu0 %v2043_v4  ;;  %v1803_v24 = vld [vmem:[%s2263_s1 + $0x18] sm:$0xff]  ;;  %vm857_vm5 = vcmask 891904   ;;  %v1806_v28 = vld [vmem:[%s2263_s1 + $0x20] sm:$0xff]  ;;  %vm1018_vm6 = vcmask 883712   ;;  %v1809_v33 = vld [vmem:[%s2263_s1 + $0x28] sm:$0xff] }
  0x17   : > { %vm1179_vm7 = vcmask 752640   ;;  %v1812_v38 = vld [vmem:[%s2263_s1 + $0x30] sm:$0xff]  ;;  %vm1340_vm8 = vcmask 744448   ;;  %v1815_v43 = vld [vmem:[%s2263_s1 + $0x38] sm:$0xff]  ;;  %vm1501_vm9 = vcmask 736256   ;;  %v1818_v50 = vld [vmem:[%s2263_s1 + $0x40] sm:$0xff] }
  0x18   : > { %s208_s30 = scalar_lea.vmem %s2262_s0, %s1888_s27  ;;  %s1887_s26 = smul.u32 24, %s201_s23  ;;  %vm1668_vm10 = vcmask 261120  }
  0x19   : > { %v218_v1 = vld [vmem:[%s208_s30 + $0x8] sm:$0xff]  ;;  %v217_v2 = vld [vmem:[%s208_s30] sm:$0xff]  ;;  %v219_v3 = vld [vmem:[%s208_s30 + $0x10] sm:$0xff]  ;;  %s1889_s27 = smul.u32 384, %s2025_s15  ;;  %s2046_s15 = smov [#allocation2]  }
  0x1a   : > { %228 = vrot.lane.b32.xlu0 %v218_v1, %s2037_s4  ;;  %226 = vrot.lane.b32.xlu1 %v217_v2, %s2037_s4  ;;  %s203_s28 = scalar_lea.vmem [#allocation2], %s1887_s26 }
  0x1b   : > { %s1687_s29 = sshll.u32 %s203_s28, 4  ;;  %s1688_s29 = int_to_ptr.vmem [resolvable:$true] %s1687_s29 }
  0x1e   : > { %230 = vrot.lane.b32.xlu0 %v219_v3, %s2037_s4  ;;  %531 = vrot.lane.b32.xlu1 %v218_v1, %s2038_s5 }
  0x22   : > { %533 = vrot.lane.b32.xlu0 %v219_v3, %s2038_s5  ;;  %529 = vrot.lane.b32.xlu1 %v217_v2, %s2038_s5  ;;  %s1685_s5 = scalar_lea.hbm %s2265_s3, %s1889_s27 }
  0x26   : > { %692 = vrot.lane.b32.xlu0 %v218_v1, %s2039_s6  ;;  %694 = vrot.lane.b32.xlu1 %v219_v3, %s2039_s6 }
  0x2a   : > { %690 = vrot.lane.b32.xlu0 %v217_v2, %s2039_s6  ;;  %853 = vrot.lane.b32.xlu1 %v218_v1, %s2040_s7  ;;  %s1671_s6 = scalar_lea.sflag [#allocation3], %s201_s23 }
  0x2e   : > { %855 = vrot.lane.b32.xlu0 %v219_v3, %s2040_s7  ;;  %851 = vrot.lane.b32.xlu1 %v217_v2, %s2040_s7  ;;  %s1957_s7 = scalar_lea.vmem %s1688_s29, 384 }
  0x2f   : > { %p1958_p12 = scmp.ne.s32.totalorder %s1688_s29, %s1957_s7 }
  0x31   : > { %p1959_p13 = pnand %p1958_p12, %p2107_p4 }
  0x32   : > { %1014 = vrot.lane.b32.xlu0 %v218_v1, %s2041_s8  ;;  %1016 = vrot.lane.b32.xlu1 %v219_v3, %s2041_s8 }
  0x33   : > { %p1960_p0 = pneg %p1959_p13 }
  0x36   : > { %1012 = vrot.lane.b32.xlu0 %v217_v2, %s2041_s8  ;;  %1175 = vrot.lane.b32.xlu1 %v218_v1, %s2042_s9  ;;  %s1961_s8 = sshll.u32 %s2046_s15, 4  ;;  %s1962_s8 = int_to_ptr.vmem [resolvable:$false] %s1961_s8 }
  0x37   : > { %p1964_p1 = scmp.lt.s32.totalorder %s1688_s29, %s1962_s8 }
  0x3a   : > { %1177 = vrot.lane.b32.xlu0 %v219_v3, %s2042_s9  ;;  %1173 = vrot.lane.b32.xlu1 %v217_v2, %s2042_s9  ;;  %s1963_s9 = scalar_lea.vmem %s1962_s8, 768 }
  0x3b   : > { %p1965_p2 = scmp.lt.s32.totalorder %s1963_s9, %s1957_s7 }
  0x3d   : > { %p1966_p3 = por %p1965_p2, %p1964_p1 }
  0x3e   : > { %1336 = vrot.lane.b32.xlu0 %v218_v1, %s2044_s10  ;;  %1338 = vrot.lane.b32.xlu1 %v219_v3, %s2044_s10 }
  0x3f   : > { %p1967_p5 = pnand %p1966_p3, %p1960_p0 }
  0x42   : > { %1334 = vrot.lane.b32.xlu0 %v217_v2, %s2044_s10  ;;  %1497 = vrot.lane.b32.xlu1 %v218_v1, %s2045_s11 }
  0x46   : > { %1499 = vrot.lane.b32.xlu0 %v219_v3, %s2045_s11  ;;  %1495 = vrot.lane.b32.xlu1 %v217_v2, %s2045_s11 }
  0x4a   : > { %1657 = vperm.xlu0 %1956, %v1654_v5  }
  0x8c   : > { %v229_v6 = vpop.permute.xlu0 %228  ;;  %v227_v7 = vpop.permute.xlu1 %226 }
  0x8d   : > { %v233_v12 = vsel %vm232_vm1, %v227_v7, %v229_v6 }
  0x90   : > { %v231_v9 = vpop.permute.xlu0 %230  ;;  %v532_v10 = vpop.permute.xlu1 %531 }
  0x91   : > { %1843 = vmatpush3.msra.mxu1 %v231_v9  ;;  %v234_v11 = vsel %vm232_vm1, %v229_v6, %v231_v9 }
  0x92   : > { %272 = vmatprep.subr.mxu0 %v234_v11  ;;  %1845 = vmatmul.mubr.msk.f32.vlgmr.msra.gmra.mxu1 %vm238_vm2, %v1795_v8 }
  0x93   : > { %273 = vmatpush1.msra.mxu0 %v233_v12  ;;  %1847 = vmatprep.subr.mxu1 %v2035_v0 }
  0x94   : > { %1848 = vmatpush3.msra.mxu1 %v219_v3  ;;  %v534_v13 = vpop.permute.xlu0 %533  ;;  %1796 = vmatmul.mubr.msk.f32.vlgmr.msra.gmra.mxu0 %vm238_vm2, %v1795_v8  ;;  %v530_v14 = vpop.permute.xlu1 %529 }
  0x95   : > { %416 = vmatprep.subr.mxu0 %v218_v1  ;;  %1849 = vmatprep.mubr.msk.f32.mxu1 %vm2036_vm0, %v2035_v0  ;;  %v537_v16 = vsel %vm535_vm3, %v532_v10, %v534_v13  ;;  %v536_v20 = vsel %vm535_vm3, %v530_v14, %v532_v10 }
  0x96   : > { %417 = vmatpush1.msra.mxu0 %v217_v2  ;;  %1852 = vmatprep.subr.mxu1 %v2035_v0 }
  0x97   : > { %1850 = vmatmul.mubr.msk.f32.vlgmr.msra.gmra.mxu1 %vm238_vm2, %v220_v15  ;;  %574 = vmatprep.subr.mxu0 %v537_v16 }
  0x98   : > { %1853 = vmatpush3.msra.mxu1 %v534_v13  ;;  %450 = vmatprep.mubr.f32.mxu0 %v2035_v0  ;;  %v693_v17 = vpop.permute.xlu0 %692  ;;  %v695_v18 = vpop.permute.xlu1 %694 }
  0x99   : > { %1798 = vmatmul.mubr.msk.f32.vlgmr.msra.gmra.mxu0 %vm238_vm2, %v220_v15  ;;  %1854 = vmatprep.mubr.msk.f32.mxu1 %vm2036_vm0, %v2035_v0  ;;  %v698_v21 = vsel %vm696_vm4, %v693_v17, %v695_v18 }
  0x9a   : > { %575 = vmatpush1.msra.mxu0 %v536_v20  ;;  %1857 = vmatprep.subr.mxu1 %v2035_v0 }
  0x9b   : > { %1855 = vmatmul.mubr.msk.f32.vlgmr.msra.gmra.mxu1 %vm238_vm2, %v1800_v19  ;;  %735 = vmatprep.subr.mxu0 %v698_v21 }
  0x9c   : > { %1858 = vmatpush3.msra.mxu1 %v695_v18  ;;  %608 = vmatprep.mubr.f32.mxu0 %v2035_v0  ;;  %v691_v22 = vpop.permute.xlu0 %690  ;;  %v854_v23 = vpop.permute.xlu1 %853 }
  0x9d   : > { %v697_v25 = vsel %vm696_vm4, %v691_v22, %v693_v17  ;;  %1801 = vmatmul.mubr.msk.f32.vlgmr.msra.gmra.mxu0 %vm238_vm2, %v1800_v19  ;;  %1859 = vmatprep.mubr.msk.f32.mxu1 %vm2036_vm0, %v2035_v0 }
  0x9e   : > { %736 = vmatpush1.msra.mxu0 %v697_v25  ;;  %769 = vmatprep.mubr.f32.mxu0 %v2035_v0 }
  0x9f   : > { %1862 = vmatprep.subr.mxu1 %v2035_v0  ;;  %1860 = vmatmul.mubr.msk.f32.vlgmr.msra.gmra.mxu1 %vm238_vm2, %v1803_v24 }
  0xa0   : > { %v856_v26 = vpop.permute.xlu0 %855  ;;  %v852_v27 = vpop.permute.xlu1 %851  ;;  %1864 = vmatprep.mubr.msk.f32.mxu1 %vm2036_vm0, %v2035_v0 }
  0xa1   : > { %1804 = vmatmul.mubr.msk.f32.vlgmr.msra.gmra.mxu0 %vm238_vm2, %v1803_v24  ;;  %v858_v29 = vsel %vm857_vm5, %v852_v27, %v854_v23  ;;  %1863 = vmatpush3.msra.mxu1 %v856_v26  ;;  %v859_v30 = vsel %vm857_vm5, %v854_v23, %v856_v26 }
  0xa2   : > { %896 = vmatprep.subr.mxu0 %v859_v30  ;;  %930 = vmatprep.mubr.f32.mxu0 %v2035_v0 }
  0xa3   : > { %897 = vmatpush1.msra.mxu0 %v858_v29  ;;  %1865 = vmatmul.mubr.msk.f32.vlgmr.msra.gmra.mxu1 %vm238_vm2, %v1806_v28 }
  0xa4   : > { %v1015_v31 = vpop.permute.xlu0 %1014  ;;  %v1017_v32 = vpop.permute.xlu1 %1016  ;;  %1867 = vmatprep.subr.mxu1 %v2035_v0  ;;  %1869 = vmatprep.mubr.msk.f32.mxu1 %vm2036_vm0, %v2035_v0 }
  0xa5   : > { %1807 = vmatmul.mubr.msk.f32.vlgmr.msra.gmra.mxu0 %vm238_vm2, %v1806_v28  ;;  %v1020_v34 = vsel %vm1018_vm6, %v1015_v31, %v1017_v32  ;;  %1868 = vmatpush3.msra.mxu1 %v1017_v32 }
  0xa6   : > { %1057 = vmatprep.subr.mxu0 %v1020_v34  ;;  %1091 = vmatprep.mubr.f32.mxu0 %v2035_v0 }
  0xa7   : > { %1870 = vmatmul.mubr.msk.f32.vlgmr.msra.gmra.mxu1 %vm238_vm2, %v1809_v33  ;;  %1872 = vmatprep.subr.mxu1 %v2035_v0 }
  0xa8   : > { %v1013_v35 = vpop.permute.xlu0 %1012  ;;  %v1176_v36 = vpop.permute.xlu1 %1175  ;;  %1874 = vmatprep.mubr.msk.f32.mxu1 %vm2036_vm0, %v2035_v0 }
  0xa9   : > { %v1019_v37 = vsel %vm1018_vm6, %v1013_v35, %v1015_v31 }
  0xaa   : > { %1058 = vmatpush1.msra.mxu0 %v1019_v37 }
  0xab   : > { %1810 = vmatmul.mubr.msk.f32.vlgmr.msra.gmra.mxu0 %vm238_vm2, %v1809_v33 }
  0xac   : > { %v1178_v39 = vpop.permute.xlu0 %1177  ;;  %v1174_v40 = vpop.permute.xlu1 %1173  ;;  %1252 = vmatprep.mubr.f32.mxu0 %v2035_v0 }
  0xad   : > { %v1180_v41 = vsel %vm1179_vm7, %v1174_v40, %v1176_v36  ;;  %1873 = vmatpush3.msra.mxu1 %v1178_v39  ;;  %v1181_v42 = vsel %vm1179_vm7, %v1176_v36, %v1178_v39 }
  0xae   : > { %1218 = vmatprep.subr.mxu0 %v1181_v42  ;;  %1875 = vmatmul.mubr.msk.f32.vlgmr.msra.gmra.mxu1 %vm238_vm2, %v1812_v38 }
  0xaf   : > { %1219 = vmatpush1.msra.mxu0 %v1180_v41  ;;  %1877 = vmatprep.subr.mxu1 %v2035_v0 }
  0xb0   : > { %v1337_v44 = vpop.permute.xlu0 %1336  ;;  %1813 = vmatmul.mubr.msk.f32.vlgmr.msra.gmra.mxu0 %vm238_vm2, %v1812_v38  ;;  %v1339_v45 = vpop.permute.xlu1 %1338  ;;  %1879 = vmatprep.mubr.msk.f32.mxu1 %vm2036_vm0, %v2035_v0 }
  0xb1   : > { %1878 = vmatpush3.msra.mxu1 %v1339_v45  ;;  %v1342_v46 = vsel %vm1340_vm8, %v1337_v44, %v1339_v45  ;;  %1413 = vmatprep.mubr.f32.mxu0 %v2035_v0 }
  0xb2   : > { %1379 = vmatprep.subr.mxu0 %v1342_v46  ;;  %1880 = vmatmul.mubr.msk.f32.vlgmr.msra.gmra.mxu1 %vm238_vm2, %v1815_v43 }
  0xb3   : > { %1882 = vmatprep.subr.mxu1 %v2035_v0  ;;  %1884 = vmatprep.mubr.msk.f32.mxu1 %vm2036_vm0, %v2035_v0 }
  0xb4   : > { %v1335_v47 = vpop.permute.xlu0 %1334  ;;  %v1498_v48 = vpop.permute.xlu1 %1497 }
  0xb5   : > { %v1341_v49 = vsel %vm1340_vm8, %v1335_v47, %v1337_v44 }
  0xb6   : > { %1380 = vmatpush1.msra.mxu0 %v1341_v49 }
  0xb7   : > { %1816 = vmatmul.mubr.msk.f32.vlgmr.msra.gmra.mxu0 %vm238_vm2, %v1815_v43 }
  0xb8   : > { %v1500_v51 = vpop.permute.xlu0 %1499  ;;  %v1496_v52 = vpop.permute.xlu1 %1495  ;;  %1574 = vmatprep.mubr.f32.mxu0 %v2035_v0 }
  0xb9   : > { %v1502_v53 = vsel %vm1501_vm9, %v1496_v52, %v1498_v48  ;;  %1883 = vmatpush3.msra.mxu1 %v1500_v51  ;;  %v1503_v54 = vsel %vm1501_vm9, %v1498_v48, %v1500_v51 }
  0xba   : > { %1540 = vmatprep.subr.mxu0 %v1503_v54  ;;  %1885 = vmatmul.mubr.msk.f32.vlgmr.msra.gmra.mxu1 %vm238_vm2, %v1818_v50 }
  0xbb   : > { %1541 = vmatpush1.msra.mxu0 %v1502_v53 }
  0xbc   : > { %1819 = vmatmul.mubr.msk.f32.vlgmr.msra.gmra.mxu0 %vm238_vm2, %v1818_v50 }
  0xc5   : > { %v1658_v42 = vpop.permute.xlu0 %1657 }
 0x152   : > { %v379_v55 = vpop.f32.mrf.mxu1 }
 0x154   : > { %v308_v56 = vpop.f32.mrf.mxu0  ;;  %v1846_v57 = vpop.f32.mrf.mxu1 }
 0x156   : > { %v310_v58 = vpop.f32.mrf.mxu0 }
 0x157   : > { %v523_v59 = vpop.f32.mrf.mxu1 }
 0x158   : > { %v524_v8 = vadd.f32 %v523_v59, %v379_v55 }
 0x159   : > { %v452_v60 = vpop.f32.mrf.mxu0  ;;  %v1851_v61 = vpop.f32.mrf.mxu1 }
 0x15a   : > { %v453_v15 = vadd.f32 %v452_v60, %v308_v56 }
 0x15b   : > { %v454_v62 = vpop.f32.mrf.mxu0  ;;  %v681_v63 = vpop.f32.mrf.mxu1 }
 0x15c   : > { %v687_v12 = vadd.f32 %v681_v63, %v524_v8  ;;  %v455_v20 = vadd.f32 %v454_v62, %v310_v58 }
 0x15d   : > { %v610_v1 = vpop.f32.mrf.mxu0  ;;  %v1856_v0 = vpop.f32.mrf.mxu1 }
 0x15e   : > { %v685_v21 = vadd.f32 %v610_v1, %v453_v15 }
 0x15f   : > { %v612_v2 = vpop.f32.mrf.mxu0  ;;  %v842_v3 = vpop.f32.mrf.mxu1 }
 0x160   : > { %v848_v17 = vadd.f32 %v842_v3, %v687_v12  ;;  %v686_v26 = vadd.f32 %v612_v2, %v455_v20 }
 0x161   : > { %v771_v4 = vpop.f32.mrf.mxu0  ;;  %v1861_v5 = vpop.f32.mrf.mxu1 }
 0x162   : > { %v846_v27 = vadd.f32 %v771_v4, %v685_v21 }
 0x163   : > { %v773_v6 = vpop.f32.mrf.mxu0  ;;  %v1003_v7 = vpop.f32.mrf.mxu1 }
 0x164   : > { %v1009_v23 = vadd.f32 %v1003_v7, %v848_v17  ;;  %v847_v29 = vadd.f32 %v773_v6, %v686_v26 }
 0x165   : > { %v932_v9 = vpop.f32.mrf.mxu0  ;;  %v1866_v10 = vpop.f32.mrf.mxu1 }
 0x166   : > { %v1007_v30 = vadd.f32 %v932_v9, %v846_v27 }
 0x167   : > { %v1164_v11 = vpop.f32.mrf.mxu1  ;;  %v934_v13 = vpop.f32.mrf.mxu0 }
 0x168   : > { %v1170_v31 = vadd.f32 %v1164_v11, %v1009_v23  ;;  %v1008_v33 = vadd.f32 %v934_v13, %v847_v29 }
 0x169   : > { %v1871_v14 = vpop.f32.mrf.mxu1 }
 0x16b   : > { %v1093_v16 = vpop.f32.mrf.mxu0 }
 0x16c   : > { %v1168_v34 = vadd.f32 %v1093_v16, %v1007_v30 }
 0x16d   : > { %v1095_v18 = vpop.f32.mrf.mxu0 }
 0x16e   : > { %v1325_v19 = vpop.f32.mrf.mxu1  ;;  %v1169_v37 = vadd.f32 %v1095_v18, %v1008_v33 }
 0x16f   : > { %v1331_v35 = vadd.f32 %v1325_v19, %v1170_v31 }
 0x170   : > { %v1876_v22 = vpop.f32.mrf.mxu1  ;;  %v1254_v24 = vpop.f32.mrf.mxu0 }
 0x171   : > { %v1329_v38 = vadd.f32 %v1254_v24, %v1168_v34 }
 0x172   : > { %v1486_v25 = vpop.f32.mrf.mxu1  ;;  %v1256_v32 = vpop.f32.mrf.mxu0 }
 0x173   : > { %v1492_v39 = vadd.f32 %v1486_v25, %v1331_v35  ;;  %v1330_v43 = vadd.f32 %v1256_v32, %v1169_v37 }
 0x174   : > { %v1881_v28 = vpop.f32.mrf.mxu1 }
 0x177   : > { %v1415_v36 = vpop.f32.mrf.mxu0 }
 0x178   : > { %v1490_v44 = vadd.f32 %v1415_v36, %v1329_v38 }
 0x179   : > { %v1417_v40 = vpop.f32.mrf.mxu0 }
 0x17a   : > { %v1647_v41 = vpop.f32.mrf.mxu1  ;;  %v1491_v48 = vadd.f32 %v1417_v40, %v1330_v43 }
 0x17b   : > { %v1653_v45 = vadd.f32 %v1647_v41, %v1492_v39 }
 0x17c   : > { %v1576_v46 = vpop.f32.mrf.mxu0  ;;  %v1886_v47 = vpop.f32.mrf.mxu1 }
 0x17d   : > { %v1662_v49 = vadd.f32 %v1658_v42, %v1653_v45  ;;  %v1651_v50 = vadd.f32 %v1576_v46, %v1490_v44 }
 0x17e   : > { %v1578_v51 = vpop.f32.mrf.mxu0 }
 0x17f   : > { %v1665_v52 = vmax.f32 %v1662_v49, 0.0  ;;  %v1660_v53 = vadd.f32 %v1658_v42, %v1651_v50  ;;  %v1652_v54 = vadd.f32 %v1578_v51, %v1491_v48 }
 0x181   : > { %1669 = vst.msk [vmem:[%s203_s28 + $0x10] sm:$0xff] %vm1668_vm10, %v1665_v52  ;;  %v1663_v55 = vmax.f32 %v1660_v53, 0.0  ;;  %v1661_v56 = vadd.f32 %v1658_v42, %v1652_v54 }
 0x183   : > { %1666 = vst [vmem:[%s203_s28] sm:$0xff] %v1663_v55  ;;  %v1664_v57 = vmax.f32 %v1661_v56, 0.0 }
 0x185   : > { %1667 = vst [vmem:[%s203_s28 + $0x8] sm:$0xff] %v1664_v57 }
 0x186   : > { %1970 = shalt.err (!%p1967_p5)
}
 0x187   : > { %s1971_s10 = scalar_lea.hbm %s1685_s5, 384  ;;  %s1975_s19 = scalar_lea.hbm %s2265_s3, 768 }
 0x188   : > { %p1972_p6 = scmp.ne.s32.totalorder %s1685_s5, %s1971_s10  ;;  %p1976_p10 = scmp.lt.s32.totalorder %s1685_s5, %s2265_s3 }
 0x189   : > { %p1977_p11 = scmp.lt.s32.totalorder %s1975_s19, %s1971_s10 }
 0x18a   : > { %p1973_p7 = pnand %p1972_p6, %p2107_p4 }
 0x18b   : > { %p1978_p12 = por %p1977_p11, %p1976_p10 }
 0x18c   : > { %p1974_p9 = pneg %p1973_p7 }
 0x18e   : > { %p1979_p13 = pnand %p1978_p12, %p1974_p9 }
 0x190   : > { %1982 = shalt.err (!%p1979_p13)
}
 0x191   : > { %1890 = dma.vmem_to_hbm [thread:$0]  (%p2107_p4), %s1688_s29, 384, %s1685_s5, %s1671_s6  }
 0x192 PF: > { %p1896_p0 = scmp.ge.s32.totalorder %s2033_s17, 2  ;;  %s1699_s26 = sand.u32 1, %s2013_s12  }
 0x193   : > { %s1700_s27 = scalar_lea.sflag [#allocation3], %s1699_s26 }
 0x194   : > { %p1893_p1 = pnand %p1896_p0, %p2114_p8 }
 0x196   : > { %p1894_p2 = pneg %p1893_p1 }
 0x198   : > { %2008 = dma.done.wait (%p1894_p2), %s1700_s27, 384  }
 0x199   : > { %2010 = vsyncadd (%p1894_p2), %s1700_s27, 4294966912  ;;  %s16_s17 = sadd.s32 1, %s2033_s17   ;;  %s2268_s12 = smov %s2017_s13 }
 0x19a   : > { %p13_p3 = scmp.ge.s32.totalorder %s16_s17, 4   ;;  %s2269_s13 = smov %s2021_s14 }
 0x19b   : > { %s2270_s14 = smov %s2120_s25  ;;  %s2271_s15 = smov %s2029_s16 }
 0x19c   : > { %s2272_s16 = smov %s2274_s20  ;;  %15 = sbr.rel (!%p13_p3) target bundleno = 4 (0x4), region = 81 }
 0x1a1   :  { %1705 = vsyncpa [#allocation3], 1 }
 0x1a2   :  { %1707 = vsyncpa [#allocation3 + $0x1], 1 }

</bundles_post_ra>
